<compile_context>
chip_gen: v7x
topology: tpu7x:2x2x1
jax: 0.10.0
libtpu: 0.0.40
codegen_flags: <defaults>
</compile_context>

<pallas_src>
import functools

import jax
import jax.numpy as jnp
from jax.experimental import pallas as pl
from jax.experimental.pallas import tpu as pltpu

BN_EPS = 1e-5
_LANE = 128     # TPU lane width (last-dim tiling)
_SUBLANE = 8    # TPU sublane width (second-to-last-dim tiling, f32)


def _round_up(n, m):
    return ((n + m - 1) // m) * m


# ------------------------------ Pallas kernel ------------------------------ #

def _make_fused_mlp_kernel(num_layers, out_pdims):
    """Kernel refs = (x, w_0, ..., w_{L-1}, bias_slab, out).

    Computes a_{l+1} = ReLU(a_l @ W_l + b_l) for l < L-1 and the final Linear
    without ReLU.  Matmuls accumulate in f32 on the MXU; the activation tile
    never leaves VMEM between layers.  `out_pdims[l]` is layer l's padded
    output width (multiple of 128), used to slice the shared bias slab.
    """
    def kernel(*refs):
        x_ref = refs[0]
        w_refs = refs[1:1 + num_layers]
        b_ref = refs[1 + num_layers]
        o_ref = refs[2 + num_layers]

        a = x_ref[...]
        for l in range(num_layers):
            n = out_pdims[l]
            y = jnp.dot(a, w_refs[l][...], preferred_element_type=jnp.float32)
            y = y + b_ref[l:l + 1, 0:n]               # (TB, N) + (1, N), f32
            if l < num_layers - 1:
                y = jnp.maximum(y, 0.0)               # ReLU
                a = y.astype(w_refs[l + 1].dtype)     # back to matmul dtype
            else:
                a = y                                 # final Linear: no ReLU
        o_ref[...] = a.astype(o_ref.dtype)
    return kernel


# ------------------------- host-side param folding ------------------------- #

def _fold_bn_into_linears(hidden_params, final_params, eps=BN_EPS):
    """Fold eval-mode BN (applied after ReLU) into the NEXT Linear's W / b.

    z = scale * ReLU(x W + b) + shift, so the following Linear z W' + b'
    becomes ReLU(x W + b) @ (scale[:, None] * W') + (shift @ W' + b').
    Folding happens in f32; weights are cast to the matmul dtype only once
    afterwards, so BN's 1/sqrt(var) scale is not re-rounded in bf16.
    """
    ws, bs = [], []
    scale = None
    shift = None
    for p in hidden_params:
        w = p["w"]
        b = p["b"].reshape(-1)
        if scale is not None:
            b = b + shift @ w
            w = scale[:, None] * w
        ws.append(w)
        bs.append(b)
        s = p["gamma"].reshape(-1) * jax.lax.rsqrt(p["var"].reshape(-1) + eps)
        scale = s
        shift = p["beta"].reshape(-1) - p["mean"].reshape(-1) * s
    w = final_params["w"]
    b = final_params["b"].reshape(-1)
    if scale is not None:
        b = b + shift @ w
        w = scale[:, None] * w
    ws.append(w)
    bs.append(b)
    return ws, bs


# ------------------------------ host wrapper -------------------------------- #

@functools.partial(jax.jit, static_argnames=("tb", "compute_dtype"))
def feedforward(x, hidden_params, final_params, *, tb=256,
                compute_dtype=jnp.bfloat16):
    """Fused MLP forward.  x: [B, input_size] -> [B, num_classes]."""
    B, d_in = x.shape
    num_classes = final_params["w"].shape[1]
    out_dtype = x.dtype

    # 1) Fold eval-mode BN into the following Linear layers (f32, host-side).
    ws, bs = _fold_bn_into_linears(hidden_params, final_params)
    num_layers = len(ws)

    # 2) Zero-pad every feature dim to a multiple of 128 lanes (lane-dense
    #    unmasked stores, full MXU columns).  Zero padding keeps the math exact.
    dims = [d_in] + [w.shape[1] for w in ws]
    pdims = [_round_up(d, _LANE) for d in dims]
    max_pdim = max(pdims)

    # 3) Batch tile: sublane-aligned (x8 f32 / x16 bf16).  If the grid would
    #    have a single step, halve the tile so the "parallel" batch axis can
    #    shard across v7x's two TensorCores.
    row_align = 16 if jnp.dtype(compute_dtype).itemsize == 2 else _SUBLANE
    tb_req = _round_up(max(int(tb), row_align), row_align)
    tb_eff = min(tb_req, _round_up(B, row_align))
    if _round_up(B, tb_eff) // tb_eff < 2:
        half = _round_up(-(-B // 2), row_align)
        if half < tb_eff:
            tb_eff = half
    b_pad = _round_up(B, tb_eff)
    grid = (b_pad // tb_eff,)

    # Padded / cast operands.
    x_p = jnp.pad(x, ((0, b_pad - B), (0, pdims[0] - d_in))).astype(compute_dtype)
    ws_p = [jnp.pad(w, ((0, pdims[l] - w.shape[0]),
                        (0, pdims[l + 1] - w.shape[1]))).astype(compute_dtype)
            for l, w in enumerate(ws)]
    # One lane-dense f32 bias slab for all layers (row l = layer l's bias).
    l_pad = _round_up(num_layers, _SUBLANE)
    max_out = max(pdims[1:])
    bias_slab = jnp.zeros((l_pad, max_out), jnp.float32)
    for l, b in enumerate(bs):
        bias_slab = bias_slab.at[l, :b.shape[0]].set(b.astype(jnp.float32))

    # BlockSpecs.  Weights / bias slab have constant index maps -> fetched once;
    # Buffered(1) drops the default double-buffer (halves resident weight VMEM).
    in_specs = [pl.BlockSpec((tb_eff, pdims[0]), lambda i: (i, 0))]
    for l in range(num_layers):
        # TODO(synk): when sum(padded weight bytes) approaches the per-core VMEM
        #   budget (64 MiB on v7x), switch weights to memory_space=pl.ANY and
        #   stream (tk, tn) tiles per layer with pltpu.emit_pipeline plus an f32
        #   VMEM accumulator so the activation stays fused in VMEM.
        in_specs.append(pl.BlockSpec((pdims[l], pdims[l + 1]), lambda i: (0, 0),
                                     pipeline_mode=pl.Buffered(1)))
    in_specs.append(pl.BlockSpec((l_pad, max_out), lambda i: (0, 0),
                                 pipeline_mode=pl.Buffered(1)))
    out_specs = pl.BlockSpec((tb_eff, pdims[-1]), lambda i: (i, 0))

    # Explicit VMEM budget: double-buffered x/out tiles + single-buffered
    # weights + bias slab + f32 intermediates, with ~25% headroom.  The scoped
    # default (16 MiB v5e / 32 MiB v6e, v7x) is far below physical VMEM.
    csize = jnp.dtype(compute_dtype).itemsize
    osize = jnp.dtype(out_dtype).itemsize
    weight_bytes = sum(pdims[l] * pdims[l + 1] for l in range(num_layers)) * csize
    vmem_needed = (2 * tb_eff * pdims[0] * csize
                   + 2 * tb_eff * pdims[-1] * osize
                   + weight_bytes
                   + l_pad * max_out * 4
                   + 2 * tb_eff * max_pdim * 4)
    vmem_limit = int(min(max(vmem_needed * 1.25, 32 * 1024 * 1024),
                         128 * 1024 * 1024))

    flops = sum(2 * b_pad * pdims[l] * pdims[l + 1] for l in range(num_layers))
    bytes_accessed = (x_p.size * csize + weight_bytes + l_pad * max_out * 4
                      + b_pad * pdims[-1] * osize)

    out = pl.pallas_call(
        _make_fused_mlp_kernel(num_layers, tuple(pdims[1:])),
        out_shape=jax.ShapeDtypeStruct((b_pad, pdims[-1]), out_dtype),
        grid=grid,
        in_specs=in_specs,
        out_specs=out_specs,
        compiler_params=pltpu.CompilerParams(
            dimension_semantics=("parallel",),    # batch tiles shard across TCs
            vmem_limit_bytes=vmem_limit),
        cost_estimate=pl.CostEstimate(
            flops=flops, transcendentals=0, bytes_accessed=bytes_accessed),
    )(x_p, *ws_p, bias_slab)

    # Strip batch / lane padding (num_classes was padded up to 128 lanes).
    return out[:B, :num_classes]


# ------------------------------ params / ref -------------------------------- #

def init_params(key, input_size, hidden_sizes, num_classes):
    """Deterministic synthetic params (PyTorch shapes, weights pre-transposed
    to [in_features, out_features])."""
    params = []
    prev = input_size
    for h in hidden_sizes:
        key, k1, k2, k3, k4, k5, k6 = jax.random.split(key, 7)
        layer = dict(
            w=jax.random.normal(k1, (prev, h), jnp.float32) * (1.0 / jnp.sqrt(prev)),
            b=jax.random.normal(k2, (1, h), jnp.float32) * 0.01,
            gamma=1.0 + 0.1 * jax.random.normal(k3, (1, h), jnp.float32),
            beta=0.1 * jax.random.normal(k4, (1, h), jnp.float32),
            mean=0.1 * jax.random.normal(k5, (1, h), jnp.float32),
            var=jnp.abs(1.0 + 0.1 * jax.random.normal(k6, (1, h), jnp.float32)),
        )
        params.append(layer)
        prev = h
    key, k1, k2 = jax.random.split(key, 3)
    final = dict(
        w=jax.random.normal(k1, (prev, num_classes), jnp.float32) * (1.0 / jnp.sqrt(prev)),
        b=jax.random.normal(k2, (1, num_classes), jnp.float32) * 0.01,
    )
    return params, final


def feedforward_ref(x, hidden_params, final_params):
    """Plain-JAX reference (straightforward Linear/ReLU/BN chain, eval mode)."""
    for p in hidden_params:
        y = jnp.maximum(x @ p["w"] + p["b"], 0.0)
        x = (y - p["mean"]) * jax.lax.rsqrt(p["var"] + BN_EPS) * p["gamma"] + p["beta"]
    return x @ final_params["w"] + final_params["b"]


if __name__ == "__main__":
    # Small shapes consistent with the module's forward; batch large enough to
    # exercise batch tiling (grid length 2 -> both TensorCores on v7x).
    batch = 256
    input_size = 32
    hidden_sizes = [64, 32]
    num_classes = 10

    key = jax.random.PRNGKey(0)
    key, kx = jax.random.split(key)
    x = jax.random.normal(kx, (batch, input_size), jnp.float32)

    hidden_params, final_params = init_params(key, input_size, hidden_sizes,
                                              num_classes)

    ref = feedforward_ref(x, hidden_params, final_params)

    # Default path: bf16 matmuls (MXU-native on v5e/v6e/v7x), f32 accumulation.
    # Tolerance is loose because the BN scale folded into bf16 weights adds a
    # little extra rounding (documented trade-off).
    out = feedforward(x, hidden_params, final_params)
    out = jax.block_until_ready(out)
    assert out.shape == (batch, num_classes)
    assert jnp.allclose(out, ref, atol=2e-1, rtol=2e-1), "bf16 mismatch vs reference"

    # f32 matmul path (tighter tolerance; TPU's default f32 matmul is still a
    # reduced-precision MXU path).
    out_f32 = feedforward(x, hidden_params, final_params,
                          compute_dtype=jnp.float32)
    out_f32 = jax.block_until_ready(out_f32)
    assert jnp.allclose(out_f32, ref, atol=5e-2, rtol=5e-2), "f32 mismatch vs reference"

    print("KERNEL_OK")
</pallas_src>

<mosaic_0001>
module attributes {stable_mosaic.version = 11 : i64} {
  func.func @kernel(%arg0: i32, %arg1: memref<128x128xbf16, #tpu.memory_space<vmem>>, %arg2: memref<128x128xbf16, #tpu.memory_space<vmem>>, %arg3: memref<128x128xbf16, #tpu.memory_space<vmem>>, %arg4: memref<128x128xbf16, #tpu.memory_space<vmem>>, %arg5: memref<8x128xf32, #tpu.memory_space<vmem>>, %arg6: memref<128x128xf32, #tpu.memory_space<vmem>>) attributes {dimension_semantics = [#tpu.dimension_semantics<parallel>], iteration_bounds = array<i64: 2>, scalar_prefetch = 0 : i64, scratch_operands = 0 : i64, tpu.core_type = #tpu.core_type<tc>, window_params = [{transform_indices = @transform_0, window_bounds = array<i64: 128, 128>}, {pipeline_mode = #tpu.pipeline_mode<synchronous>, transform_indices = @transform_1, window_bounds = array<i64: 128, 128>}, {pipeline_mode = #tpu.pipeline_mode<synchronous>, transform_indices = @transform_2, window_bounds = array<i64: 128, 128>}, {pipeline_mode = #tpu.pipeline_mode<synchronous>, transform_indices = @transform_3, window_bounds = array<i64: 128, 128>}, {pipeline_mode = #tpu.pipeline_mode<synchronous>, transform_indices = @transform_4, window_bounds = array<i64: 8, 128>}, {transform_indices = @transform_5, window_bounds = array<i64: 128, 128>}]} {
    %c0 = arith.constant 0 : index
    %c0_0 = arith.constant 0 : index
    %0 = vector.load %arg1[%c0, %c0_0] : memref<128x128xbf16, #tpu.memory_space<vmem>>, vector<128x128xbf16>
    %c0_1 = arith.constant 0 : index
    %c0_2 = arith.constant 0 : index
    %1 = vector.load %arg2[%c0_1, %c0_2] : memref<128x128xbf16, #tpu.memory_space<vmem>>, vector<128x128xbf16>
    %cst = arith.constant dense<0.000000e+00> : vector<128x128xf32>
    %2 = tpu.matmul %0, %1, %cst {dimension_numbers = #tpu.dot_dimension_numbers<[1], [0], [0], [1], [0, 0, 1, 1], [], []>} : vector<128x128xbf16>, vector<128x128xbf16>, vector<128x128xf32> -> vector<128x128xf32>
    %c0_3 = arith.constant 0 : index
    %c0_4 = arith.constant 0 : index
    %3 = vector.load %arg5[%c0_3, %c0_4] : memref<8x128xf32, #tpu.memory_space<vmem>>, vector<1x128xf32>
    %4 = vector.broadcast %3 : vector<1x128xf32> to vector<128x128xf32>
    %5 = arith.addf %2, %4 : vector<128x128xf32>
    %cst_5 = arith.constant 0.000000e+00 : f32
    %6 = vector.broadcast %cst_5 : f32 to vector<128x128xf32>
    %7 = arith.maximumf %5, %6 : vector<128x128xf32>
    %8 = arith.truncf %7 : vector<128x128xf32> to vector<128x128xbf16>
    %c0_6 = arith.constant 0 : index
    %c0_7 = arith.constant 0 : index
    %9 = vector.load %arg3[%c0_6, %c0_7] : memref<128x128xbf16, #tpu.memory_space<vmem>>, vector<128x128xbf16>
    %cst_8 = arith.constant dense<0.000000e+00> : vector<128x128xf32>
    %10 = tpu.matmul %8, %9, %cst_8 {dimension_numbers = #tpu.dot_dimension_numbers<[1], [0], [0], [1], [0, 0, 1, 1], [], []>} : vector<128x128xbf16>, vector<128x128xbf16>, vector<128x128xf32> -> vector<128x128xf32>
    %c1 = arith.constant 1 : index
    %c0_9 = arith.constant 0 : index
    %11 = vector.load %arg5[%c1, %c0_9] : memref<8x128xf32, #tpu.memory_space<vmem>>, vector<1x128xf32>
    %12 = vector.broadcast %11 : vector<1x128xf32> to vector<128x128xf32>
    %13 = arith.addf %10, %12 : vector<128x128xf32>
    %cst_10 = arith.constant 0.000000e+00 : f32
    %14 = vector.broadcast %cst_10 : f32 to vector<128x128xf32>
    %15 = arith.maximumf %13, %14 : vector<128x128xf32>
    %16 = arith.truncf %15 : vector<128x128xf32> to vector<128x128xbf16>
    %c0_11 = arith.constant 0 : index
    %c0_12 = arith.constant 0 : index
    %17 = vector.load %arg4[%c0_11, %c0_12] : memref<128x128xbf16, #tpu.memory_space<vmem>>, vector<128x128xbf16>
    %cst_13 = arith.constant dense<0.000000e+00> : vector<128x128xf32>
    %18 = tpu.matmul %16, %17, %cst_13 {dimension_numbers = #tpu.dot_dimension_numbers<[1], [0], [0], [1], [0, 0, 1, 1], [], []>} : vector<128x128xbf16>, vector<128x128xbf16>, vector<128x128xf32> -> vector<128x128xf32>
    %c2 = arith.constant 2 : index
    %c0_14 = arith.constant 0 : index
    %19 = vector.load %arg5[%c2, %c0_14] : memref<8x128xf32, #tpu.memory_space<vmem>>, vector<1x128xf32>
    %20 = vector.broadcast %19 : vector<1x128xf32> to vector<128x128xf32>
    %21 = arith.addf %18, %20 : vector<128x128xf32>
    %c0_15 = arith.constant 0 : index
    %c0_16 = arith.constant 0 : index
    %22 = vector.load %arg6[%c0_15, %c0_16] : memref<128x128xf32, #tpu.memory_space<vmem>>, vector<128x128xf32>
    tpu.vector_store %arg6[%c0_15, %c0_16], %21 {strides = array<i32>} : memref<128x128xf32, #tpu.memory_space<vmem>>, vector<128x128xf32>,
    return
  }
  func.func @transform_0(%arg0: i32) -> (i32, i32) {
    %c0_i32 = arith.constant 0 : i32
    %c0_i32_0 = arith.constant 0 : i32
    return %arg0, %c0_i32 : i32, i32
  }
  func.func @transform_1(%arg0: i32) -> (i32, i32) {
    %c0_i32 = arith.constant 0 : i32
    %c0_i32_0 = arith.constant 0 : i32
    %c0_i32_1 = arith.constant 0 : i32
    return %c0_i32, %c0_i32_0 : i32, i32
  }
  func.func @transform_2(%arg0: i32) -> (i32, i32) {
    %c0_i32 = arith.constant 0 : i32
    %c0_i32_0 = arith.constant 0 : i32
    %c0_i32_1 = arith.constant 0 : i32
    return %c0_i32, %c0_i32_0 : i32, i32
  }
  func.func @transform_3(%arg0: i32) -> (i32, i32) {
    %c0_i32 = arith.constant 0 : i32
    %c0_i32_0 = arith.constant 0 : i32
    %c0_i32_1 = arith.constant 0 : i32
    return %c0_i32, %c0_i32_0 : i32, i32
  }
  func.func @transform_4(%arg0: i32) -> (i32, i32) {
    %c0_i32 = arith.constant 0 : i32
    %c0_i32_0 = arith.constant 0 : i32
    %c0_i32_1 = arith.constant 0 : i32
    return %c0_i32, %c0_i32_0 : i32, i32
  }
  func.func @transform_5(%arg0: i32) -> (i32, i32) {
    %c0_i32 = arith.constant 0 : i32
    %c0_i32_0 = arith.constant 0 : i32
    return %arg0, %c0_i32 : i32, i32
  }
}

</mosaic_0001>

<bundles_post_ra>
// kernel: feedforward.1
= control target key start
LH: loop header
LB: loop body
LE: loop exit
PB: predicated region body
PF: predicated region fallthrough
CT: control target
= control target key end

     0   :  { %s1195_s18 = smov 0   ;;  %s1361_s0 = inlined_call_operand.vmem [shape: bf16[256,128], index: 0, kind: input, shape index: {}]   ;;  %s1362_s1 = inlined_call_operand.vmem [shape: bf16[128,128], index: 1, kind: input, shape index: {}]   ;;  %s1363_s2 = inlined_call_operand.vmem [shape: bf16[128,128], index: 2, kind: input, shape index: {}]   ;;  %s1364_s3 = inlined_call_operand.vmem [shape: bf16[128,128], index: 3, kind: input, shape index: {}]   ;;  %s1365_s4 = inlined_call_operand.vmem [shape: f32[8,128], index: 4, kind: input, shape index: {}]   ;;  %s1366_s5 = inlined_call_operand.vmem [shape: f32[256,128], index: 5, kind: output, shape index: {}]  }
   0x1 LB: > { %s911_s19 = sadd.s32 4294967295, %s1163_s18   ;;  %p915_p0 = scmp.ge.s32.totalorder %s1163_s18, 1  ;;  %s1163_s18 = sphi %s1195_s18, %s15_s18  }
   0x2   : > { %p188_p1 = scmp.lt.s32.totalorder %s1163_s18, 3 }
   0x4   : > { %p189_p2 = pnand %p915_p0, %p188_p1 }
   0x5   : > { %v1125_v0 = vld [vmem:[%s1362_s1] sm:$0xff] (!%p189_p2)   ;;  %s916_s22 = sshll.u32 (!%p189_p2), %s911_s19, 4  ;;  %v1126_v1 = vld [vmem:[%s1362_s1 + $0x8] sm:$0xff] (!%p189_p2)   ;;  %v1127_v2 = vld [vmem:[%s1362_s1 + $0x10] sm:$0xff] (!%p189_p2)  }
   0x6   : > { %192 = sbr.rel (%p189_p2) target bundleno = 724 (0x2d4), region = 40  ;;  %p217_p3 = scmp.lt.s32.totalorder (!%p189_p2), %s916_s22, 31  ;;  %1005 = vmatprep.subr.bf16.mxu0 (!%p189_p2), %v1125_v0  ;;  %v1128_v3 = vld [vmem:[%s1362_s1 + $0x18] sm:$0xff] (!%p189_p2)   ;;  %v1129_v5 = vld [vmem:[%s1362_s1 + $0x20] sm:$0xff] (!%p189_p2)   ;;  %v1130_v6 = vld [vmem:[%s1362_s1 + $0x28] sm:$0xff] (!%p189_p2)  }
   0x7   : > { %1006 = vmatpush3.bf16.msra.mxu0 (!%p189_p2), %v1125_v0  ;;  %v1141_v7 = vld [vmem:[%s1363_s2] sm:$0xff] (!%p189_p2)   ;;  %v1142_v8 = vld [vmem:[%s1363_s2 + $0x8] sm:$0xff] (!%p189_p2)   ;;  %v1131_v9 = vld [vmem:[%s1362_s1 + $0x30] sm:$0xff] (!%p189_p2)  }
   0x8   : > { %1007 = vmatprep.subr.bf16.mxu0 (!%p189_p2), %v1126_v1  ;;  %1037 = vmatprep.subr.bf16.mxu1 (!%p189_p2), %v1141_v7  ;;  %v1143_v10 = vld [vmem:[%s1363_s2 + $0x10] sm:$0xff] (!%p189_p2)   ;;  %v1132_v11 = vld [vmem:[%s1362_s1 + $0x38] sm:$0xff] (!%p189_p2)   ;;  %v1145_v13 = vld [vmem:[%s1363_s2 + $0x20] sm:$0xff] (!%p189_p2)  }
   0x9   : > { %1038 = vmatpush3.bf16.msra.mxu1 (!%p189_p2), %v1141_v7  ;;  %v1144_v12 = vld [vmem:[%s1363_s2 + $0x18] sm:$0xff] (!%p189_p2)   ;;  %v1146_v16 = vld [vmem:[%s1363_s2 + $0x28] sm:$0xff] (!%p189_p2)   ;;  %v1147_v22 = vld [vmem:[%s1363_s2 + $0x30] sm:$0xff] (!%p189_p2)  }
   0xa   : > { %1039 = vmatprep.subr.bf16.mxu1 (!%p189_p2), %v1142_v8  ;;  %v1148_v23 = vld [vmem:[%s1363_s2 + $0x38] sm:$0xff] (!%p189_p2)   ;;  %v1149_v24 = vld [vmem:[%s1364_s3] sm:$0xff] (!%p189_p2)   ;;  %v1150_v25 = vld [vmem:[%s1364_s3 + $0x8] sm:$0xff] (!%p189_p2)  }
   0xb   : > { %1008 = vmatpush3.bf16.msra.mxu0 (!%p189_p2), %v1126_v1  ;;  %v1151_v26 = vld [vmem:[%s1364_s3 + $0x10] sm:$0xff] (!%p189_p2)   ;;  %v1279_v27 = vld [vmem:[%s1364_s3 + $0x18] sm:$0xff] (!%p189_p2)   ;;  %v1285_v28 = vld [vmem:[%s1364_s3 + $0x20] sm:$0xff] (!%p189_p2)  }
   0xc   : > { %1009 = vmatprep.subr.bf16.mxu0 (!%p189_p2), %v1127_v2  ;;  %v1292_v29 = vld [vmem:[%s1364_s3 + $0x28] sm:$0xff] (!%p189_p2)   ;;  %v1300_v30 = vld [vmem:[%s1365_s4] ss:$0 sm:$0xff] (!%p189_p2) }
   0xd   : > { %s1368_s22 = smov (!%p217_p3, %s916_s22), 31  ;;  %1040 = vmatpush3.bf16.msra.mxu1 %v1142_v8 }
   0xe   : > { %s917_s27 = sshll.u32 %s1368_s22, 2  ;;  %1041 = vmatprep.subr.bf16.mxu1 %v1143_v10  ;;  %s919_s7 = sshll.u32 %s1368_s22, 3 }
   0xf   : > { %s1218_s30 = scalar_lea.vmem %s1361_s0, %s917_s27  ;;  %1010 = vmatpush3.bf16.msra.mxu0 %v1127_v2  ;;  %s1340_s12 = scalar_lea.vmem %s1366_s5, %s919_s7 }
  0x10   : > { %v1133_v4 = vld [vmem:[%s1218_s30] sm:$0xff]   ;;  %1011 = vmatprep.subr.bf16.mxu0 %v1128_v3  ;;  %v1134_v14 = vld [vmem:[%s1218_s30 + $0x8] sm:$0xff]   ;;  %v1135_v15 = vld [vmem:[%s1218_s30 + $0x10] sm:$0xff]  }
  0x11   : > { %1021 = vmatprep.mubr.bf16.mxu0 %v1133_v4  ;;  %1042 = vmatpush3.bf16.msra.mxu1 %v1143_v10  ;;  %v1136_v17 = vld [vmem:[%s1218_s30 + $0x18] sm:$0xff]   ;;  %v1137_v18 = vld [vmem:[%s1218_s30 + $0x20] sm:$0xff]   ;;  %v1138_v19 = vld [vmem:[%s1218_s30 + $0x28] sm:$0xff]  }
  0x12   : > { %1043 = vmatprep.subr.bf16.mxu1 %v1144_v12  ;;  %v1139_v20 = vld [vmem:[%s1218_s30 + $0x30] sm:$0xff]   ;;  %v1140_v21 = vld [vmem:[%s1218_s30 + $0x38] sm:$0xff]  }
  0x13   : > { %1012 = vmatpush3.bf16.msra.mxu0 %v1128_v3 }
  0x14   : > { %1013 = vmatprep.subr.bf16.mxu0 %v1129_v5 }
  0x15   : > { %1044 = vmatpush3.bf16.msra.mxu1 %v1144_v12 }
  0x16   : > { %1045 = vmatprep.subr.bf16.mxu1 %v1145_v13 }
  0x17   : > { %1014 = vmatpush3.bf16.msra.mxu0 %v1129_v5 }
  0x18   : > { %1015 = vmatprep.subr.bf16.mxu0 %v1130_v6 }
  0x19   : > { %1046 = vmatpush3.bf16.msra.mxu1 %v1145_v13 }
  0x1a   : > { %1047 = vmatprep.subr.bf16.mxu1 %v1146_v16 }
  0x1b   : > { %1016 = vmatpush3.bf16.msra.mxu0 %v1130_v6 }
  0x1c   : > { %1017 = vmatprep.subr.bf16.mxu0 %v1131_v9 }
  0x1d   : > { %1048 = vmatpush3.bf16.msra.mxu1 %v1146_v16 }
  0x1e   : > { %1049 = vmatprep.subr.bf16.mxu1 %v1147_v22 }
  0x1f   : > { %1018 = vmatpush3.bf16.msra.mxu0 %v1131_v9 }
  0x20   : > { %1019 = vmatprep.subr.bf16.mxu0 %v1132_v11 }
  0x21   : > { %1050 = vmatpush3.bf16.msra.mxu1 %v1147_v22 }
  0x22   : > { %1051 = vmatprep.subr.bf16.mxu1 %v1148_v23 }
  0x23   : > { %1020 = vmatpush3.bf16.msra.mxu0 %v1132_v11 }
  0x24   : > { %1069 = vmatprep.subr.bf16.mxu0 %v1149_v24 }
  0x25   : > { %1052 = vmatpush3.bf16.msra.mxu1 %v1148_v23  ;;  %v1155_v23 = vld [vmem:[%s1364_s3 + $0x30] sm:$0xff]  }
  0x26   : > { %1022 = vmatmul.mubr.bf16.vlgmr.msra.gmra.mrb[0].mxu0 %v1134_v14  ;;  %1101 = vmatprep.subr.bf16.mxu1 %v1149_v24 }
  0x27   : > { %1025 = vmatprep.mubr.bf16.mxu0 %v1135_v15  ;;  %1070 = vmatpush3.bf16.msra.mxu0 %v1149_v24 }
  0x28   : > { %1071 = vmatprep.subr.bf16.mxu0 %v1150_v25 }
  0x2b   : > { %1072 = vmatpush3.bf16.msra.mxu0 %v1150_v25 }
  0x2c   : > { %1073 = vmatprep.subr.bf16.mxu0 %v1151_v26 }
  0x2e   : > { %1026 = vmatmul.mubr.bf16.gmra.mrb[4].mxu0 %v1136_v17 }
  0x2f   : > { %1029 = vmatprep.mubr.bf16.mxu0 %v1137_v18  ;;  %1074 = vmatpush3.bf16.msra.mxu0 %v1151_v26 }
  0x30   : > { %1075 = vmatprep.subr.bf16.mxu0 %v1279_v27 }
  0x33   : > { %1076 = vmatpush3.bf16.msra.mxu0 %v1279_v27 }
  0x34   : > { %1077 = vmatprep.subr.bf16.mxu0 %v1285_v28 }
  0x36   : > { %1030 = vmatmul.mubr.bf16.gmra.mrb[8].mxu0 %v1138_v19 }
  0x37   : > { %1033 = vmatprep.mubr.bf16.mxu0 %v1139_v20  ;;  %1078 = vmatpush3.bf16.msra.mxu0 %v1285_v28 }
  0x38   : > { %1079 = vmatprep.subr.bf16.mxu0 %v1292_v29 }
  0x3b   : > { %1080 = vmatpush3.bf16.msra.mxu0 %v1292_v29 }
  0x3c   : > { %1081 = vmatprep.subr.bf16.mxu0 %v1155_v23 }
  0x3e   : > { %1034 = vmatmul.mubr.bf16.gmra.mrb[12].mxu0 %v1140_v21 }
  0x3f   : > { %1082 = vmatpush3.bf16.msra.mxu0 %v1155_v23 }
  0xf9   : > { %v1023_v31 = vpop.f32.mrb[0].mxu0 }
  0xfa   : > { %v405_v32 = vadd.f32 %v1023_v31, %v1300_v30  ;;  %v396_v33 = vpop.f32.mrb[1].mxu0 }
  0xfb   : > { %v397_v34 = vadd.f32 %v1300_v30, %v396_v33  ;;  %v1024_v35 = vpop.f32.mrb[2].mxu0 }
  0xfc   : > { %v408_v36 = vadd.f32 %v1024_v35, %v1300_v30  ;;  %v399_v37 = vpop.f32.mrb[3].mxu0  ;;  %v461_v39 = vmax.f32 %v405_v32, 0.0 }
  0xfd   : > { %v400_v38 = vadd.f32 %v1300_v30, %v399_v37  ;;  %v459_v41 = vmax.f32 %v397_v34, 0.0 }
  0xfe   : > { %v462_v40 = vmax.f32 %v408_v36, 0.0 }
  0xff   : > { %v460_v42 = vmax.f32 %v400_v38, 0.0 }
 0x100   : > { %v476_v43 = vpack.c.bf16 %v462_v40, %v461_v39 }
 0x101   : > { %v1027_v44 = vpop.f32.mrb[4].mxu0  ;;  %v475_v45 = vpack.c.bf16 %v460_v42, %v459_v41 }
 0x102   : > { %v421_v46 = vadd.f32 %v1027_v44, %v1300_v30  ;;  %v412_v47 = vpop.f32.mrb[5].mxu0 }
 0x103   : > { %v413_v48 = vadd.f32 %v1300_v30, %v412_v47  ;;  %v1028_v49 = vpop.f32.mrb[6].mxu0  ;;  %1053 = vmatprep.mubr.bf16.mxu1 %v475_v45 }
 0x104   : > { %v424_v50 = vadd.f32 %v1028_v49, %v1300_v30  ;;  %v415_v51 = vpop.f32.mrb[7].mxu0  ;;  %1054 = vmatmul.mubr.bf16.vlgmr.msra.gmra.mrb[0].mxu1 %v476_v43  ;;  %v465_v53 = vmax.f32 %v421_v46, 0.0 }
 0x105   : > { %v416_v52 = vadd.f32 %v1300_v30, %v415_v51  ;;  %1109 = vmatpush3.bf16.msra.mxu1 %v1149_v24  ;;  %v463_v55 = vmax.f32 %v413_v48, 0.0  ;;  %v1156_v24 = vld [vmem:[%s1364_s3 + $0x38] sm:$0xff]  }
 0x106   : > { %v466_v54 = vmax.f32 %v424_v50, 0.0  ;;  %1102 = vmatprep.subr.bf16.mxu1 %v1150_v25  ;;  %1083 = vmatprep.subr.bf16.mxu0 %v1156_v24 }
 0x107   : > { %v464_v56 = vmax.f32 %v416_v52, 0.0  ;;  %1084 = vmatpush3.bf16.msra.mxu0 %v1156_v24 }
 0x108   : > { %v478_v57 = vpack.c.bf16 %v466_v54, %v465_v53 }
 0x109   : > { %v477_v58 = vpack.c.bf16 %v464_v56, %v463_v55  ;;  %v1031_v59 = vpop.f32.mrb[8].mxu0  ;;  %1110 = vmatpush3.bf16.msra.mxu1 %v1150_v25  ;;  %v937_v25 = vld [vmem:[%s1365_s4 + $0x1] ss:$0 sm:$0xff] }
 0x10a   : > { %v437_v60 = vadd.f32 %v1031_v59, %v1300_v30  ;;  %v428_v61 = vpop.f32.mrb[9].mxu0  ;;  %1103 = vmatprep.subr.bf16.mxu1 %v1151_v26 }
 0x10b   : > { %v429_v62 = vadd.f32 %v1300_v30, %v428_v61  ;;  %v1032_v63 = vpop.f32.mrb[10].mxu0  ;;  %1057 = vmatprep.mubr.bf16.mxu1 %v477_v58 }
 0x10c   : > { %v440_v0 = vadd.f32 %v1032_v63, %v1300_v30  ;;  %v431_v1 = vpop.f32.mrb[11].mxu0  ;;  %1058 = vmatmul.mubr.bf16.gmra.mrb[4].mxu1 %v478_v57  ;;  %v469_v3 = vmax.f32 %v437_v60, 0.0 }
 0x10d   : > { %v432_v2 = vadd.f32 %v1300_v30, %v431_v1  ;;  %1111 = vmatpush3.bf16.msra.mxu1 %v1151_v26  ;;  %v467_v5 = vmax.f32 %v429_v62, 0.0 }
 0x10e   : > { %v470_v4 = vmax.f32 %v440_v0, 0.0  ;;  %1104 = vmatprep.subr.bf16.mxu1 %v1279_v27 }
 0x10f   : > { %v468_v6 = vmax.f32 %v432_v2, 0.0 }
 0x110   : > { %v480_v7 = vpack.c.bf16 %v470_v4, %v469_v3 }
 0x111   : > { %v479_v8 = vpack.c.bf16 %v468_v6, %v467_v5  ;;  %v1035_v9 = vpop.f32.mrb[12].mxu0  ;;  %1112 = vmatpush3.bf16.msra.mxu1 %v1279_v27 }
 0x112   : > { %v453_v10 = vadd.f32 %v1035_v9, %v1300_v30  ;;  %v444_v11 = vpop.f32.mrb[13].mxu0  ;;  %1105 = vmatprep.subr.bf16.mxu1 %v1285_v28 }
 0x113   : > { %v445_v12 = vadd.f32 %v1300_v30, %v444_v11  ;;  %v1036_v13 = vpop.f32.mrb[14].mxu0  ;;  %1061 = vmatprep.mubr.bf16.mxu1 %v479_v8 }
 0x114   : > { %v456_v14 = vadd.f32 %v1036_v13, %v1300_v30  ;;  %v447_v15 = vpop.f32.mrb[15].mxu0  ;;  %1062 = vmatmul.mubr.bf16.gmra.mrb[8].mxu1 %v480_v7  ;;  %v473_v17 = vmax.f32 %v453_v10, 0.0 }
 0x115   : > { %v448_v16 = vadd.f32 %v1300_v30, %v447_v15  ;;  %1113 = vmatpush3.bf16.msra.mxu1 %v1285_v28  ;;  %v471_v19 = vmax.f32 %v445_v12, 0.0 }
 0x116   : > { %v474_v18 = vmax.f32 %v456_v14, 0.0  ;;  %1106 = vmatprep.subr.bf16.mxu1 %v1292_v29 }
 0x117   : > { %v472_v20 = vmax.f32 %v448_v16, 0.0 }
 0x118   : > { %v482_v21 = vpack.c.bf16 %v474_v18, %v473_v17  ;;  %v946_v18 = vld [vmem:[%s1365_s4 + $0x2] ss:$0 sm:$0xff] }
 0x119   : > { %v481_v22 = vpack.c.bf16 %v472_v20, %v471_v19  ;;  %1114 = vmatpush3.bf16.msra.mxu1 %v1292_v29 }
 0x11a   : > { %1107 = vmatprep.subr.bf16.mxu1 %v1155_v23 }
 0x11b   : > { %1065 = vmatprep.mubr.bf16.mxu1 %v481_v22 }
 0x11c   : > { %1066 = vmatmul.mubr.bf16.gmra.mrb[12].mxu1 %v482_v21 }
 0x11d   : > { %1115 = vmatpush3.bf16.msra.mxu1 %v1155_v23 }
 0x11e   : > { %1108 = vmatprep.subr.bf16.mxu1 %v1156_v24 }
 0x121   : > { %1116 = vmatpush3.bf16.msra.mxu1 %v1156_v24 }
 0x1d7   : > { %v1055_v26 = vpop.f32.mrb[0].mxu1 }
 0x1d8   : > { %v595_v27 = vadd.f32 %v1055_v26, %v937_v25  ;;  %v586_v28 = vpop.f32.mrb[1].mxu1 }
 0x1d9   : > { %v587_v29 = vadd.f32 %v937_v25, %v586_v28  ;;  %v1056_v30 = vpop.f32.mrb[2].mxu1 }
 0x1da   : > { %v598_v31 = vadd.f32 %v1056_v30, %v937_v25  ;;  %v589_v32 = vpop.f32.mrb[3].mxu1  ;;  %v651_v34 = vmax.f32 %v595_v27, 0.0 }
 0x1db   : > { %v590_v33 = vadd.f32 %v937_v25, %v589_v32  ;;  %v649_v36 = vmax.f32 %v587_v29, 0.0 }
 0x1dc   : > { %v652_v35 = vmax.f32 %v598_v31, 0.0 }
 0x1dd   : > { %v650_v37 = vmax.f32 %v590_v33, 0.0 }
 0x1de   : > { %v666_v38 = vpack.c.bf16 %v652_v35, %v651_v34 }
 0x1df   : > { %v665_v39 = vpack.c.bf16 %v650_v37, %v649_v36  ;;  %v1059_v40 = vpop.f32.mrb[4].mxu1 }
 0x1e0   : > { %v611_v41 = vadd.f32 %v1059_v40, %v937_v25  ;;  %v602_v42 = vpop.f32.mrb[5].mxu1 }
 0x1e1   : > { %v603_v43 = vadd.f32 %v937_v25, %v602_v42  ;;  %v1060_v44 = vpop.f32.mrb[6].mxu1  ;;  %1085 = vmatprep.mubr.bf16.mxu0 %v665_v39 }
 0x1e2   : > { %v614_v45 = vadd.f32 %v1060_v44, %v937_v25  ;;  %v605_v46 = vpop.f32.mrb[7].mxu1  ;;  %1086 = vmatmul.mubr.bf16.vlgmr.msra.gmra.mrb[16].mxu0 %v666_v38  ;;  %v655_v48 = vmax.f32 %v611_v41, 0.0 }
 0x1e3   : > { %v606_v47 = vadd.f32 %v937_v25, %v605_v46  ;;  %v653_v50 = vmax.f32 %v603_v43, 0.0 }
 0x1e4   : > { %v656_v49 = vmax.f32 %v614_v45, 0.0 }
 0x1e5   : > { %v654_v51 = vmax.f32 %v606_v47, 0.0 }
 0x1e6   : > { %v668_v52 = vpack.c.bf16 %v656_v49, %v655_v48 }
 0x1e7   : > { %v667_v53 = vpack.c.bf16 %v654_v51, %v653_v50  ;;  %v1063_v54 = vpop.f32.mrb[8].mxu1 }
 0x1e8   : > { %v627_v55 = vadd.f32 %v1063_v54, %v937_v25  ;;  %v618_v56 = vpop.f32.mrb[9].mxu1 }
 0x1e9   : > { %v619_v57 = vadd.f32 %v937_v25, %v618_v56  ;;  %v1064_v58 = vpop.f32.mrb[10].mxu1  ;;  %1089 = vmatprep.mubr.bf16.mxu0 %v667_v53 }
 0x1ea   : > { %v630_v59 = vadd.f32 %v1064_v58, %v937_v25  ;;  %v621_v60 = vpop.f32.mrb[11].mxu1  ;;  %1090 = vmatmul.mubr.bf16.gmra.mrb[20].mxu0 %v668_v52  ;;  %v659_v62 = vmax.f32 %v627_v55, 0.0 }
 0x1eb   : > { %v622_v61 = vadd.f32 %v937_v25, %v621_v60  ;;  %v657_v0 = vmax.f32 %v619_v57, 0.0 }
 0x1ec   : > { %v660_v63 = vmax.f32 %v630_v59, 0.0 }
 0x1ed   : > { %v658_v1 = vmax.f32 %v622_v61, 0.0 }
 0x1ee   : > { %v670_v2 = vpack.c.bf16 %v660_v63, %v659_v62 }
 0x1ef   : > { %v669_v3 = vpack.c.bf16 %v658_v1, %v657_v0  ;;  %v1067_v4 = vpop.f32.mrb[12].mxu1 }
 0x1f0   : > { %v643_v5 = vadd.f32 %v1067_v4, %v937_v25  ;;  %v634_v6 = vpop.f32.mrb[13].mxu1 }
 0x1f1   : > { %v635_v7 = vadd.f32 %v937_v25, %v634_v6  ;;  %v1068_v8 = vpop.f32.mrb[14].mxu1  ;;  %1093 = vmatprep.mubr.bf16.mxu1 %v669_v3 }
 0x1f2   : > { %v646_v9 = vadd.f32 %v1068_v8, %v937_v25  ;;  %v637_v10 = vpop.f32.mrb[15].mxu1  ;;  %1094 = vmatmul.mubr.bf16.vlgmr.msra.gmra.mrb[16].mxu1 %v670_v2  ;;  %v663_v12 = vmax.f32 %v643_v5, 0.0 }
 0x1f3   : > { %v638_v11 = vadd.f32 %v937_v25, %v637_v10  ;;  %v661_v14 = vmax.f32 %v635_v7, 0.0 }
 0x1f4   : > { %v664_v13 = vmax.f32 %v646_v9, 0.0 }
 0x1f5   : > { %v662_v15 = vmax.f32 %v638_v11, 0.0 }
 0x1f6   : > { %v672_v16 = vpack.c.bf16 %v664_v13, %v663_v12 }
 0x1f7   : > { %v671_v17 = vpack.c.bf16 %v662_v15, %v661_v14 }
 0x1f9   : > { %1097 = vmatprep.mubr.bf16.mxu1 %v671_v17 }
 0x1fa   : > { %1098 = vmatmul.mubr.bf16.gmra.mrb[20].mxu1 %v672_v16 }
 0x2b5   : > { %v1087_v19 = vpop.f32.mrb[16].mxu0 }
 0x2b6   : > { %v785_v20 = vadd.f32 %v1087_v19, %v946_v18  ;;  %v776_v21 = vpop.f32.mrb[17].mxu0 }
 0x2b7   : > { %v777_v22 = vadd.f32 %v946_v18, %v776_v21  ;;  %v1088_v23 = vpop.f32.mrb[18].mxu0 }
 0x2b8   : > { %841 = vst [vmem:[%s1340_s12 + $0x10] sm:$0xff] %v785_v20  ;;  %v788_v24 = vadd.f32 %v1088_v23, %v946_v18  ;;  %v779_v25 = vpop.f32.mrb[19].mxu0 }
 0x2b9   : > { %839 = vst [vmem:[%s1340_s12] sm:$0xff] %v777_v22  ;;  %v780_v26 = vadd.f32 %v946_v18, %v779_v25 }
 0x2ba   : > { %842 = vst [vmem:[%s1340_s12 + $0x18] sm:$0xff] %v788_v24 }
 0x2bb   : > { %840 = vst [vmem:[%s1340_s12 + $0x8] sm:$0xff] %v780_v26 }
 0x2bd   : > { %v1091_v27 = vpop.f32.mrb[20].mxu0 }
 0x2be   : > { %v801_v28 = vadd.f32 %v1091_v27, %v946_v18  ;;  %v792_v29 = vpop.f32.mrb[21].mxu0 }
 0x2bf   : > { %v793_v30 = vadd.f32 %v946_v18, %v792_v29  ;;  %v1092_v31 = vpop.f32.mrb[22].mxu0 }
 0x2c0   : > { %845 = vst [vmem:[%s1340_s12 + $0x30] sm:$0xff] %v801_v28  ;;  %v804_v32 = vadd.f32 %v1092_v31, %v946_v18  ;;  %v795_v33 = vpop.f32.mrb[23].mxu0 }
 0x2c1   : > { %843 = vst [vmem:[%s1340_s12 + $0x20] sm:$0xff] %v793_v30  ;;  %v796_v34 = vadd.f32 %v946_v18, %v795_v33 }
 0x2c2   : > { %846 = vst [vmem:[%s1340_s12 + $0x38] sm:$0xff] %v804_v32 }
 0x2c3   : > { %844 = vst [vmem:[%s1340_s12 + $0x28] sm:$0xff] %v796_v34 }
 0x2c5   : > { %v1095_v35 = vpop.f32.mrb[16].mxu1 }
 0x2c6   : > { %v817_v36 = vadd.f32 %v1095_v35, %v946_v18  ;;  %v808_v37 = vpop.f32.mrb[17].mxu1 }
 0x2c7   : > { %v809_v38 = vadd.f32 %v946_v18, %v808_v37  ;;  %v1096_v39 = vpop.f32.mrb[18].mxu1 }
 0x2c8   : > { %849 = vst [vmem:[%s1340_s12 + $0x50] sm:$0xff] %v817_v36  ;;  %v820_v40 = vadd.f32 %v1096_v39, %v946_v18  ;;  %v811_v41 = vpop.f32.mrb[19].mxu1 }
 0x2c9   : > { %847 = vst [vmem:[%s1340_s12 + $0x40] sm:$0xff] %v809_v38  ;;  %v812_v42 = vadd.f32 %v946_v18, %v811_v41 }
 0x2ca   : > { %850 = vst [vmem:[%s1340_s12 + $0x58] sm:$0xff] %v820_v40 }
 0x2cb   : > { %848 = vst [vmem:[%s1340_s12 + $0x48] sm:$0xff] %v812_v42 }
 0x2cd   : > { %v1099_v43 = vpop.f32.mrb[20].mxu1 }
 0x2ce   : > { %v833_v44 = vadd.f32 %v1099_v43, %v946_v18  ;;  %v824_v45 = vpop.f32.mrb[21].mxu1 }
 0x2cf   : > { %v825_v46 = vadd.f32 %v946_v18, %v824_v45  ;;  %v1100_v47 = vpop.f32.mrb[22].mxu1 }
 0x2d0   : > { %853 = vst [vmem:[%s1340_s12 + $0x70] sm:$0xff] %v833_v44  ;;  %v836_v48 = vadd.f32 %v1100_v47, %v946_v18  ;;  %v827_v49 = vpop.f32.mrb[23].mxu1 }
 0x2d1   : > { %851 = vst [vmem:[%s1340_s12 + $0x60] sm:$0xff] %v825_v46  ;;  %v828_v50 = vadd.f32 %v946_v18, %v827_v49 }
 0x2d2   : > { %854 = vst [vmem:[%s1340_s12 + $0x78] sm:$0xff] %v836_v48 }
 0x2d3   : > { %852 = vst [vmem:[%s1340_s12 + $0x68] sm:$0xff] %v828_v50 }
 0x2d4 PF: > { %s15_s18 = sadd.s32 1, %s1163_s18  }
 0x2d5   : > { %p12_p4 = scmp.ge.s32.totalorder %s15_s18, 4  }
 0x2d7   :  { %14 = sbr.rel (!%p12_p4) target bundleno = 1 (0x1), region = 70 }

</bundles_post_ra>
